<compile_context>
chip_gen: v6e
topology: v6e:2x2x1
jax: 0.10.0
libtpu: 0.0.40
codegen_flags: <defaults>
</compile_context>

<pallas_src>
import jax
import jax.numpy as jnp
from jax.experimental import pallas as pl
from jax.experimental.pallas import tpu as pltpu


def _round_up(x, m):
    return ((x + m - 1) // m) * m


def _pick_th(H, tmax=512):
    """Lane-dense (multiple-of-128) hidden tile dividing padded H."""
    Hp = _round_up(H, 128)
    for t in range(min(tmax, Hp), 0, -128):
        if Hp % t == 0:
            return t, Hp
    return 128, Hp


def _pick_tm(M, tmax=512):
    """Sublane-aligned M tile; avoid padding away more than ~1/8 of M."""
    M8 = _round_up(M, 8)
    if M8 <= tmax:
        return M8
    for t in (512, 256, 128, 64, 32, 16, 8):
        if t > tmax:
            continue
        if _round_up(M8, t) - M8 <= max(M8 // 8, 8):
            return t
    return 8


def prepare_residual_linear_params(w, b, *, th=None):
    """Pad + cast the Linear weights ONCE at init (hoisted out of hot path).

    w: (H, H), b: (H,) or (1, H).
    Returns (w_p bf16 (Hp, Hp), b_p f32 (1, Hp), H, th).
    """
    H = w.shape[0]
    assert w.shape == (H, H)
    b = jnp.asarray(b).reshape(1, H)
    if th is None:
        th, Hp = _pick_th(H)
    else:
        assert th % 128 == 0
        Hp = _round_up(H, th)
    w_p = jnp.zeros((Hp, Hp), jnp.bfloat16).at[:H, :H].set(w.astype(jnp.bfloat16))
    b_p = jnp.zeros((1, Hp), jnp.float32).at[:, :H].set(b.astype(jnp.float32))
    return w_p, b_p, H, th


# ----------------------------------------------------------------------------
# Kernels
# ----------------------------------------------------------------------------
def _res_linear_kernel_ktiled(x_ref, w_ref, b_ref, o_ref, acc_ref):
    """One (i, j, k) step of out = x @ W + b + x with K tiled (tn == tk)."""
    j = pl.program_id(1)
    k = pl.program_id(2)

    @pl.when(k == 0)
    def _init():
        # Fold the bias into the accumulator init; epilogue is cast + store.
        acc_ref[...] = jnp.broadcast_to(
            b_ref[...].astype(jnp.float32), acc_ref.shape)

    acc_ref[...] += jnp.dot(
        x_ref[...].astype(jnp.bfloat16), w_ref[...],
        preferred_element_type=jnp.float32)

    @pl.when(k == j)
    def _residual():
        # tn == tk, so the LHS tile at k == j is exactly the residual tile of
        # output block (i, j): no separate residual HBM stream needed.
        acc_ref[...] += x_ref[...].astype(jnp.float32)

    @pl.when(k == pl.num_programs(2) - 1)
    def _store():
        o_ref[...] = acc_ref[...].astype(o_ref.dtype)


def _res_linear_kernel_fullk(x_ref, w_ref, b_ref, o_ref):
    """out(i, j) = x_row_panel @ W_col_panel + b + x[:, j-block].

    K collapsed into a single step: no accumulator scratch, no init/finalize.
    """
    tn = o_ref.shape[1]
    j = pl.program_id(1)
    acc = jnp.dot(
        x_ref[...].astype(jnp.bfloat16), w_ref[...],
        preferred_element_type=jnp.float32)
    acc += b_ref[...].astype(jnp.float32)
    if x_ref.shape[1] == tn:
        res = x_ref[...]
    else:
        # Residual tile = column block j of the x row panel already in VMEM.
        res = x_ref[:, pl.ds(pl.multiple_of(j * tn, 128), tn)]
    o_ref[...] = (acc + res.astype(jnp.float32)).astype(o_ref.dtype)


# ----------------------------------------------------------------------------
# Wrapper
# ----------------------------------------------------------------------------
def residual_linear(x, w_p, b_p, H, *, th, tm_max=512, allow_k_collapse=True,
                    single_k_budget_bytes=12 * 1024 * 1024):
    """Residual(Linear): out = x @ W + b + x, fused in one Pallas kernel.

    x: (M, H); w_p: (Hp, Hp) bf16 padded weights; b_p: (1, Hp) f32 padded bias.
    """
    M, Hx = x.shape
    assert Hx == H
    Hp = w_p.shape[0]
    dtype = x.dtype
    itemsize = jnp.dtype(dtype).itemsize

    tm = _pick_tm(M, tm_max)
    Mp = _round_up(M, tm)
    tn = th

    # Per-call activation padding only (weights padded once at init).
    if (Mp, Hp) != (M, H):
        x_p = jnp.zeros((Mp, Hp), dtype).at[:M, :H].set(x)
    else:
        x_p = x

    cost = pl.CostEstimate(
        flops=2 * Mp * Hp * Hp,
        transcendentals=0,
        bytes_accessed=(Mp * Hp * itemsize * max(Hp // tn, 1)  # x re-reads
                        + Hp * Hp * 2 * max(Mp // tm, 1)       # bf16 W re-reads
                        + Mp * Hp * itemsize                   # output
                        + Hp * 4),                             # bias
    )

    # Collapse K when x row panel + bf16 W column panel + output tile
    # (double-buffered) fit a conservative scoped-VMEM budget.
    single_k_vmem = 2 * (tm * Hp * itemsize    # x row panel
                         + Hp * tn * 2         # bf16 W column panel
                         + tm * tn * itemsize)  # output tile
    if allow_k_collapse and single_k_vmem <= single_k_budget_bytes:
        grid = (Mp // tm, Hp // tn)
        out_p = pl.pallas_call(
            _res_linear_kernel_fullk,
            out_shape=jax.ShapeDtypeStruct((Mp, Hp), dtype),
            grid_spec=pltpu.PrefetchScalarGridSpec(
                num_scalar_prefetch=0,
                grid=grid,
                in_specs=[
                    pl.BlockSpec((tm, Hp), lambda i, j: (i, 0)),   # x row panel
                    pl.BlockSpec((Hp, tn), lambda i, j: (0, j)),   # W col panel
                    pl.BlockSpec((1, tn), lambda i, j: (0, j)),    # bias
                ],
                out_specs=pl.BlockSpec((tm, tn), lambda i, j: (i, j)),
            ),
            compiler_params=pltpu.CompilerParams(
                dimension_semantics=("parallel", "parallel"),
            ),
            cost_estimate=cost,
        )(x_p, w_p, b_p)
    else:
        tk = th  # tn == tk is required by the residual-at-(k == j) trick.
        grid = (Mp // tm, Hp // tn, Hp // tk)
        out_p = pl.pallas_call(
            _res_linear_kernel_ktiled,
            out_shape=jax.ShapeDtypeStruct((Mp, Hp), dtype),
            grid_spec=pltpu.PrefetchScalarGridSpec(
                num_scalar_prefetch=0,
                grid=grid,
                in_specs=[
                    pl.BlockSpec((tm, tk), lambda i, j, k: (i, k)),  # x
                    pl.BlockSpec((tk, tn), lambda i, j, k: (k, j)),  # W
                    pl.BlockSpec((1, tn), lambda i, j, k: (0, j)),   # bias
                ],
                out_specs=pl.BlockSpec((tm, tn), lambda i, j, k: (i, j)),
                scratch_shapes=[pltpu.VMEM((tm, tn), jnp.float32)],
            ),
            compiler_params=pltpu.CompilerParams(
                dimension_semantics=("parallel", "parallel", "arbitrary"),
            ),
            cost_estimate=cost,
        )(x_p, w_p, b_p)

    if (Mp, Hp) != (M, H):
        out_p = out_p[:M, :H]
    return out_p


if __name__ == "__main__":
    key = jax.random.PRNGKey(0)
    k_x, k_w, k_b, k_x2, k_w2, k_b2 = jax.random.split(key, 6)

    # --- Test 1: canonical small shape (batch=2, seq=8, hidden=32) ----------
    batch, seq, hidden = 2, 8, 32
    M = batch * seq
    x = jax.random.normal(k_x, (M, hidden), dtype=jnp.float32)
    w = jax.random.normal(k_w, (hidden, hidden), dtype=jnp.float32) * 0.05
    b = jax.random.normal(k_b, (1, hidden), dtype=jnp.float32) * 0.05

    w_p, b_p, H, th = prepare_residual_linear_params(w, b)
    out = jax.block_until_ready(residual_linear(x, w_p, b_p, H, th=th))
    assert out.shape == (M, hidden)

    # Reference matched to the kernel's numerics (bf16 MXU operands, f32 acc).
    ref_bf16 = (jnp.dot(x.astype(jnp.bfloat16), w.astype(jnp.bfloat16),
                        preferred_element_type=jnp.float32) + b + x)
    ref_f32 = x @ w + b + x
    assert jnp.allclose(out, ref_bf16, atol=1e-3, rtol=1e-3), "mismatch (bf16 ref)"
    assert jnp.allclose(out, ref_f32, atol=3e-2, rtol=3e-2), "mismatch (f32 ref)"

    # --- Test 2: force the K-tiled (accumulator) path ------------------------
    M2, H2 = 64, 256
    x2 = jax.random.normal(k_x2, (M2, H2), dtype=jnp.float32)
    w2 = jax.random.normal(k_w2, (H2, H2), dtype=jnp.float32) * 0.05
    b2 = jax.random.normal(k_b2, (1, H2), dtype=jnp.float32) * 0.05
    w2_p, b2_p, _, th2 = prepare_residual_linear_params(w2, b2, th=128)
    out2 = jax.block_until_ready(
        residual_linear(x2, w2_p, b2_p, H2, th=th2, allow_k_collapse=False))
    ref2_bf16 = (jnp.dot(x2.astype(jnp.bfloat16), w2.astype(jnp.bfloat16),
                         preferred_element_type=jnp.float32) + b2 + x2)
    assert out2.shape == (M2, H2)
    assert jnp.allclose(out2, ref2_bf16, atol=2e-3, rtol=2e-3), "mismatch (k-tiled)"

    print("KERNEL_OK")
</pallas_src>

<mosaic_0001>
module attributes {stable_mosaic.version = 11 : i64} {
  func.func @_res_linear_kernel_fullk(%arg0: i32, %arg1: i32, %arg2: memref<16x128xf32, #tpu.memory_space<vmem>>, %arg3: memref<128x128xbf16, #tpu.memory_space<vmem>>, %arg4: memref<1x128xf32, #tpu.memory_space<vmem>>, %arg5: memref<16x128xf32, #tpu.memory_space<vmem>>) attributes {dimension_semantics = [#tpu.dimension_semantics<parallel>, #tpu.dimension_semantics<parallel>], iteration_bounds = array<i64: 1, 1>, scalar_prefetch = 0 : i64, scratch_operands = 0 : i64, tpu.core_type = #tpu.core_type<tc>, window_params = [{transform_indices = @transform_0, window_bounds = array<i64: 16, 128>}, {transform_indices = @transform_1, window_bounds = array<i64: 128, 128>}, {transform_indices = @transform_2, window_bounds = array<i64: 1, 128>}, {transform_indices = @transform_3, window_bounds = array<i64: 16, 128>}]} {
    %c0 = arith.constant 0 : index
    %c0_0 = arith.constant 0 : index
    %0 = vector.load %arg2[%c0, %c0_0] : memref<16x128xf32, #tpu.memory_space<vmem>>, vector<16x128xf32>
    %1 = arith.truncf %0 : vector<16x128xf32> to vector<16x128xbf16>
    %c0_1 = arith.constant 0 : index
    %c0_2 = arith.constant 0 : index
    %2 = vector.load %arg3[%c0_1, %c0_2] : memref<128x128xbf16, #tpu.memory_space<vmem>>, vector<128x128xbf16>
    %cst = arith.constant dense<0.000000e+00> : vector<16x128xf32>
    %3 = tpu.matmul %1, %2, %cst {dimension_numbers = #tpu.dot_dimension_numbers<[1], [0], [0], [1], [0, 0, 1, 1], [], []>} : vector<16x128xbf16>, vector<128x128xbf16>, vector<16x128xf32> -> vector<16x128xf32>
    %c0_3 = arith.constant 0 : index
    %c0_4 = arith.constant 0 : index
    %4 = vector.load %arg4[%c0_3, %c0_4] : memref<1x128xf32, #tpu.memory_space<vmem>>, vector<1x128xf32>
    %5 = vector.broadcast %4 : vector<1x128xf32> to vector<16x128xf32>
    %6 = arith.addf %3, %5 : vector<16x128xf32>
    %c0_5 = arith.constant 0 : index
    %c0_6 = arith.constant 0 : index
    %7 = vector.load %arg2[%c0_5, %c0_6] : memref<16x128xf32, #tpu.memory_space<vmem>>, vector<16x128xf32>
    %8 = arith.addf %6, %7 : vector<16x128xf32>
    %c0_7 = arith.constant 0 : index
    %c0_8 = arith.constant 0 : index
    %9 = vector.load %arg5[%c0_7, %c0_8] : memref<16x128xf32, #tpu.memory_space<vmem>>, vector<16x128xf32>
    tpu.vector_store %arg5[%c0_7, %c0_8], %8 {strides = array<i32>} : memref<16x128xf32, #tpu.memory_space<vmem>>, vector<16x128xf32>,
    return
  }
  func.func @transform_0(%arg0: i32, %arg1: i32) -> (i32, i32) {
    %c0_i32 = arith.constant 0 : i32
    %c0_i32_0 = arith.constant 0 : i32
    return %arg0, %c0_i32 : i32, i32
  }
  func.func @transform_1(%arg0: i32, %arg1: i32) -> (i32, i32) {
    %c0_i32 = arith.constant 0 : i32
    %c0_i32_0 = arith.constant 0 : i32
    return %c0_i32, %arg1 : i32, i32
  }
  func.func @transform_2(%arg0: i32, %arg1: i32) -> (i32, i32) {
    %c0_i32 = arith.constant 0 : i32
    %c0_i32_0 = arith.constant 0 : i32
    return %c0_i32, %arg1 : i32, i32
  }
  func.func @transform_3(%arg0: i32, %arg1: i32) -> (i32, i32) {
    %c0_i32 = arith.constant 0 : i32
    return %arg0, %arg1 : i32, i32
  }
}

</mosaic_0001>

<bundles_post_ra>
// kernel: tpu_custom_call.1
= control target key start
LH: loop header
LB: loop body
LE: loop exit
PB: predicated region body
PF: predicated region fallthrough
CT: control target
= control target key end

     0   :  { %8 = vsyncpa [#allocation3], 0  ;;  %s349_s0 = inlined_call_operand.hbm [shape: f32[16,128], index: 0, kind: input, shape index: {}]   ;;  %s350_s1 = inlined_call_operand.hbm [shape: bf16[128,128], index: 1, kind: input, shape index: {}]   ;;  %s351_s2 = inlined_call_operand.vmem [shape: f32[1,128], index: 2, kind: input, shape index: {}]   ;;  %s352_s3 = inlined_call_operand.hbm [shape: f32[16,128], index: 3, kind: output, shape index: {}]  }
   0x1   :  { %9 = vsyncpa [#allocation6], 0 }
   0x2   :  { %10 = vsyncpa [#allocation4], 0  ;;  %s302_s12 = smov [#allocation2]  }
   0x3   :  { %s16_s13 = sshll.u32 %s302_s12, 4  ;;  %s17_s13 = int_to_ptr.vmem [resolvable:$true] %s16_s13 }
   0x4   :  { %s244_s14 = scalar_lea.vmem %s17_s13, 256  ;;  %p249_p1 = scmp.lt.s32.totalorder %s17_s13, %s17_s13 }
   0x5   :  { %p245_p0 = scmp.ne.s32.totalorder %s17_s13, %s244_s14  ;;  %p250_p2 = scmp.lt.s32.totalorder %s244_s14, %s244_s14 }
   0x7   :  { %p251_p3 = por %p250_p2, %p249_p1 }
   0x9   :  { %p252_p4 = pnand %p251_p3, %p245_p0 }
   0xb   :  { %255 = shalt.err (!%p252_p4)
}
   0xc   :  { %s303_s15 = smov 128   ;;  %s304_s16 = smov 8  }
   0xd   :  { %22 = dma.hbm_to_vmem [thread:$0]  %s349_s0, 256, %s17_s13, [#allocation3], %s303_s15, %s303_s15, %s304_s16  }
   0xe   :  { %s305_s19 = smov [#allocation5]  }
   0xf   :  { %s28_s20 = sshll.u32 %s305_s19, 4  ;;  %s29_s20 = int_to_ptr.vmem [resolvable:$true] %s28_s20 }
  0x10   :  { %s264_s21 = scalar_lea.vmem %s29_s20, 1024  ;;  %p269_p6 = scmp.lt.s32.totalorder %s29_s20, %s29_s20 }
  0x11   :  { %p265_p5 = scmp.ne.s32.totalorder %s29_s20, %s264_s21  ;;  %p270_p7 = scmp.lt.s32.totalorder %s264_s21, %s264_s21 }
  0x13   :  { %p271_p8 = por %p270_p7, %p269_p6 }
  0x15   :  { %p272_p9 = pnand %p271_p8, %p265_p5 }
  0x17   :  { %275 = shalt.err (!%p272_p9)
}
  0x18   :  { %s306_s22 = smov 64   ;;  %s307_s23 = smov 4  }
  0x19   :  { %34 = dma.hbm_to_vmem [thread:$0]  %s350_s1, 1024, %s29_s20, [#allocation6], %s306_s22, %s306_s22, %s307_s23  }
  0x1a   :  { %296 = dma.done.wait [#allocation3], 256  }
  0x1b   :  { %297 = vsyncadd [#allocation3], 4294967040 }
  0x1c   :  { %298 = dma.done.wait [#allocation6], 1024  }
  0x1d   :  { %299 = vsyncadd [#allocation6], 4294966272  ;;  %v308_v0 = vmov 0.0   ;;  %vm309_vm0 = vmmov 0   ;;  %v228_v1 = vld [vmem:[#allocation5 + $0x38] sm:$0xff]   ;;  %v229_v2 = vld [vmem:[#allocation5 + $0x30] sm:$0xff]  }
  0x1e   :  { %199 = vmatprep.subr.bf16.mxu0 %v308_v0  ;;  %215 = vmatprep.mubr.msk.bf16.mxu0 %vm309_vm0, %v308_v0  ;;  %v230_v3 = vld [vmem:[#allocation5 + $0x28] sm:$0xff]   ;;  %v231_v4 = vld [vmem:[#allocation5 + $0x20] sm:$0xff]   ;;  %v232_v5 = vld [vmem:[#allocation5 + $0x18] sm:$0xff]   ;;  %s310_s26 = smov [#allocation7]  }
  0x1f   :  { %200 = vmatpush3.bf16.msra.mxu0 %v228_v1  ;;  %v233_v6 = vld [vmem:[#allocation5 + $0x10] sm:$0xff]   ;;  %v234_v7 = vld [vmem:[#allocation5 + $0x8] sm:$0xff]   ;;  %v235_v8 = vld [vmem:[#allocation5] sm:$0xff]   ;;  %s168_s27 = sshll.u32 %s310_s26, 4  ;;  %s169_s27 = int_to_ptr.vmem [resolvable:$true] %s168_s27 }
  0x20   :  { %201 = vmatprep.subr.bf16.mxu0 %v308_v0  ;;  %v44_v9 = vld [vmem:[#allocation2] sm:$0xff]  ;;  %v45_v10 = vld [vmem:[#allocation2 + $0x8] sm:$0xff]  ;;  %s276_s28 = scalar_lea.vmem %s169_s27, 256  ;;  %p281_p11 = scmp.lt.s32.totalorder %s169_s27, %s169_s27 }
  0x21   :  { %v46_v11 = vpack.c.bf16 %v45_v10, %v44_v9  ;;  %v181_v12 = vld [vmem:[%s351_s2] ss:$0 sm:$0xff]  ;;  %p277_p10 = scmp.ne.s32.totalorder %s169_s27, %s276_s28  ;;  %p282_p12 = scmp.lt.s32.totalorder %s276_s28, %s276_s28 }
  0x23   :  { %202 = vmatpush3.bf16.msra.mxu0 %v229_v2  ;;  %p283_p13 = por %p282_p12, %p281_p11 }
  0x24   :  { %203 = vmatprep.subr.bf16.mxu0 %v308_v0 }
  0x25   :  { %p284_p0 = pnand %p283_p13, %p277_p10 }
  0x27   :  { %204 = vmatpush3.bf16.msra.mxu0 %v230_v3 }
  0x28   :  { %205 = vmatprep.subr.bf16.mxu0 %v308_v0 }
  0x2b   :  { %206 = vmatpush3.bf16.msra.mxu0 %v231_v4 }
  0x2c   :  { %207 = vmatprep.subr.bf16.mxu0 %v308_v0 }
  0x2f   :  { %208 = vmatpush3.bf16.msra.mxu0 %v232_v5 }
  0x30   :  { %209 = vmatprep.subr.bf16.mxu0 %v308_v0 }
  0x33   :  { %210 = vmatpush3.bf16.msra.mxu0 %v233_v6 }
  0x34   :  { %211 = vmatprep.subr.bf16.mxu0 %v308_v0 }
  0x37   :  { %212 = vmatpush3.bf16.msra.mxu0 %v234_v7 }
  0x38   :  { %213 = vmatprep.subr.bf16.mxu0 %v308_v0 }
  0x3b   :  { %214 = vmatpush3.bf16.msra.mxu0 %v235_v8 }
  0x3e   :  { %216 = vmatmul.mubr.bf16.vlgmr.msra.gmra.mxu0 %v46_v11 }
  0xfe   :  { %v152_v13 = vpop.f32.mrf.mxu0 }
  0xff   :  { %v153_v14 = vadd.f32 %v181_v12, %v152_v13 }
 0x100   :  { %v217_v15 = vpop.f32.mrf.mxu0 }
 0x101   :  { %v159_v16 = vadd.f32 %v153_v14, %v44_v9 }
 0x102   :  { %v155_v17 = vpop.f32.mrf.mxu0 }
 0x103   :  { %161 = vst [vmem:[#allocation7] sm:$0xff] %v159_v16  ;;  %v156_v18 = vadd.f32 %v181_v12, %v155_v17 }
 0x104   :  { %v218_v19 = vpop.f32.mrf.mxu0 }
 0x105   :  { %v160_v20 = vadd.f32 %v156_v18, %v45_v10 }
 0x107   :  { %162 = vst [vmem:[#allocation7 + $0x8] sm:$0xff] %v160_v20 }
 0x108   :  { %287 = shalt.err (!%p284_p0)
}
 0x109   :  { %174 = dma.vmem_to_hbm [thread:$0]  %s169_s27, 256, %s352_s3, [#allocation4], %s303_s15, %s303_s15, %s304_s16  }
 0x10a   :  { %300 = dma.done.wait [#allocation4], 256  }
 0x10b   :  { %301 = vsyncadd [#allocation4], 4294967040 }
 0x10c   :  { %178 = vsyncpa [#allocation3], 1 }
 0x10d   :  { %179 = vsyncpa [#allocation6], 1 }
 0x10e   :  { %180 = vsyncpa [#allocation4], 1 }

</bundles_post_ra>
